<compile_context>
chip_gen: v7x
topology: tpu7x:2x2x1
jax: 0.10.0
libtpu: 0.0.40
codegen_flags: <defaults>
</compile_context>

<pallas_src>
import functools

import jax
import jax.numpy as jnp
from jax.experimental import pallas as pl
from jax.experimental.pallas import tpu as pltpu

LANES = 128                   # vreg lane width (fast axis)
SUBLANES = 8
TARGET_TILE_BYTES = 4 << 20   # ~4 MiB lane-dense streaming tiles
INPUT_BUFFERS = 3             # pipeline depth for the streaming input
NUM_CORES = 2                 # leading "parallel" grid axis (v7x megacore)
VMEM_LIMIT_BYTES = 32 << 20   # raise v5e's 16-MiB default; <= physical on all gens


def _loss_elem(x, mode, tval):
    """Elementwise GAN loss term in f32 (shared by kernels and the JAX tail path)."""
    t = jnp.float32(tval)
    if mode == "lsgan":           # nn.MSELoss: (x - t)^2
        d = x - t
        return d * d
    if mode == "vanilla":         # nn.BCEWithLogitsLoss, numerically stable form
        return jnp.maximum(x, 0.0) - x * t + jnp.log1p(jnp.exp(-jnp.abs(x)))
    if mode == "wgan":            # t is the sign: -1 for real (-mean), +1 for fake (+mean)
        return x * t
    raise NotImplementedError(f"gan mode {mode} not implemented")


def _single_block_kernel(x_ref, out_ref, *, mode, tval):
    """Small inputs: one block, no scratch accumulator, direct sum to SMEM."""
    x = x_ref[...].astype(jnp.float32)
    out_ref[0] = jnp.sum(_loss_elem(x, mode, tval))


def _tiled_sum_kernel(x_ref, out_ref, acc_ref, *, mode, tval, block_rows,
                      rows_body, row_blocks, steps_per_core):
    """Streaming path: per-core resident (1,128) accumulator, partial sums out."""
    c = pl.program_id(0)          # core (parallel) axis
    i = pl.program_id(1)          # streaming (arbitrary) axis

    @pl.when(i == 0)
    def _():
        acc_ref[...] = jnp.zeros_like(acc_ref)

    x = x_ref[...].astype(jnp.float32)
    val = _loss_elem(x, mode, tval)

    g = c * steps_per_core + i    # global row-block index
    exact = (NUM_CORES * steps_per_core == row_blocks
             and rows_body % block_rows == 0)
    if exact:
        # Every (c, i) is a distinct, fully-valid block: pure fast path.
        acc_ref[...] += jnp.sum(val, axis=0, keepdims=True)
    else:
        # Only blocks with g >= row_blocks - 1 can be ragged or out of range.
        @pl.when(g < row_blocks - 1)
        def _():
            acc_ref[...] += jnp.sum(val, axis=0, keepdims=True)

        @pl.when(g >= row_blocks - 1)
        def _():
            valid = jnp.clip(rows_body - g * block_rows, 0, block_rows)
            row = jax.lax.broadcasted_iota(jnp.int32, val.shape, 0)
            masked = jnp.where(row < valid, val, 0.0)   # select, never multiply
            acc_ref[...] += jnp.sum(masked, axis=0, keepdims=True)

    @pl.when(i == steps_per_core - 1)
    def _():
        out_ref[0] = acc_ref[...]


def _streaming_in_spec(block_rows, index_map):
    try:
        return pl.BlockSpec((block_rows, LANES), index_map,
                            pipeline_mode=pl.Buffered(INPUT_BUFFERS))
    except (TypeError, AttributeError):
        # Older JAX without pipeline_mode: fall back to default double-buffering.
        return pl.BlockSpec((block_rows, LANES), index_map)


def _body_sum_single(x2d, mode, tval):
    rows = x2d.shape[0]
    out = pl.pallas_call(
        functools.partial(_single_block_kernel, mode=mode, tval=tval),
        out_shape=jax.ShapeDtypeStruct((1,), jnp.float32),
        grid=(1,),
        in_specs=[pl.BlockSpec((rows, LANES), lambda i: (0, 0))],
        out_specs=pl.BlockSpec(memory_space=pltpu.SMEM),
        compiler_params=pltpu.CompilerParams(dimension_semantics=("arbitrary",)),
    )(x2d)
    return out[0]


def _body_sum_tiled(x2d, mode, tval, block_rows):
    rows_body = x2d.shape[0]
    row_blocks = pl.cdiv(rows_body, block_rows)
    steps_per_core = pl.cdiv(row_blocks, NUM_CORES)

    def in_map(c, i):
        # Clamp so out-of-range (c, i) pairs re-fetch the last valid block;
        # their contribution is masked to zero inside the kernel.
        return (jnp.minimum(c * steps_per_core + i, row_blocks - 1), 0)

    kernel = functools.partial(
        _tiled_sum_kernel, mode=mode, tval=tval, block_rows=block_rows,
        rows_body=rows_body, row_blocks=row_blocks,
        steps_per_core=steps_per_core)

    partials = pl.pallas_call(
        kernel,
        out_shape=jax.ShapeDtypeStruct((NUM_CORES, 1, LANES), jnp.float32),
        grid=(NUM_CORES, steps_per_core),
        in_specs=[_streaming_in_spec(block_rows, in_map)],
        out_specs=pl.BlockSpec((1, 1, LANES), lambda c, i: (c, 0, 0)),
        scratch_shapes=[pltpu.VMEM((1, LANES), jnp.float32)],
        compiler_params=pltpu.CompilerParams(
            dimension_semantics=("parallel", "arbitrary"),
            vmem_limit_bytes=VMEM_LIMIT_BYTES),
    )(x2d)
    return jnp.sum(partials)


def gan_loss(sample, target_is_real, gan_mode, real_label=1.0, fake_label=0.0,
             block_rows=None):
    """Pallas equivalent of GANLoss(gan_mode)(sample, target_is_real)."""
    if gan_mode in ("lsgan", "vanilla"):
        tval = float(real_label if target_is_real else fake_label)
    elif gan_mode == "wgan":
        tval = -1.0 if target_is_real else 1.0
    else:
        raise NotImplementedError(f"gan mode {gan_mode} not implemented")

    n_valid = int(sample.size)
    flat = sample.reshape(-1)          # contiguous reshape, no copy
    rows_body = n_valid // LANES
    n_body = rows_body * LANES

    # <128-element lane tail: handled in plain JAX (no full-array jnp.pad).
    if n_body != n_valid:
        tail = flat[n_body:]           # tiny (<128 element) slice
        tail_sum = jnp.sum(_loss_elem(tail.astype(jnp.float32), gan_mode, tval))
    else:
        tail_sum = jnp.float32(0.0)

    if rows_body == 0:
        total = tail_sum               # sub-vreg input: nothing for the kernel
    else:
        # TODO(synk): for unaligned sizes the prefix slice below may still
        # materialize a body copy; a manual pl.ANY + chunked-DMA path would
        # make it truly zero-copy.
        body = flat if n_body == n_valid else flat[:n_body]
        x2d = body.reshape(rows_body, LANES)

        if block_rows is None:
            itemsize = jnp.dtype(sample.dtype).itemsize
            block_rows = max(SUBLANES, TARGET_TILE_BYTES // (LANES * itemsize))
        block_rows -= block_rows % SUBLANES
        assert block_rows >= SUBLANES

        if rows_body <= block_rows:
            body_sum = _body_sum_single(x2d, gan_mode, tval)
        else:
            body_sum = _body_sum_tiled(x2d, gan_mode, tval, block_rows)
        total = body_sum + tail_sum

    loss = total / jnp.float32(n_valid)
    return loss.astype(sample.dtype)


def _gan_loss_ref(sample, target_is_real, gan_mode, real_label=1.0, fake_label=0.0):
    """Pure-JAX reference mirroring the PyTorch module."""
    x = sample.astype(jnp.float32)
    if gan_mode == "lsgan":
        t = real_label if target_is_real else fake_label
        return jnp.mean((x - t) ** 2)
    if gan_mode == "vanilla":
        t = real_label if target_is_real else fake_label
        return jnp.mean(jnp.maximum(x, 0.0) - x * t + jnp.log1p(jnp.exp(-jnp.abs(x))))
    if gan_mode == "wgan":
        return -jnp.mean(x) if target_is_real else jnp.mean(x)
    raise NotImplementedError(gan_mode)


if __name__ == "__main__":
    key = jax.random.PRNGKey(0)
    k0, k1, k2, k3, k4 = jax.random.split(key, 5)

    # (sample, block_rows override (small values force the tiled path), tolerance)
    cases = [
        # aligned size, single-block fast path
        (jax.random.normal(k0, (2, 4, 16, 16), jnp.float32), None, 1e-5),
        # 210 elements: JAX lane-tail path + 1-row kernel body
        (jax.random.normal(k1, (2, 3, 7, 5), jnp.float32), None, 1e-5),
        # 204800 elements: tiled megacore path with ragged last block
        (jax.random.normal(k2, (2, 4, 160, 160), jnp.float32), 256, 1e-5),
        # 131072 elements: tiled megacore path, exactly divisible (fast path)
        (jax.random.normal(k3, (2, 4, 128, 128), jnp.float32), 256, 1e-5),
        # bf16 streamed natively, upcast in-kernel (loss returned in bf16)
        (jax.random.normal(k4, (2, 4, 32, 32), jnp.float32).astype(jnp.bfloat16),
         None, 2e-2),
    ]

    results = {}
    for si, (sample, br, _) in enumerate(cases):
        for mode in ("lsgan", "vanilla", "wgan"):
            for real in (True, False):
                results[(si, mode, real)] = gan_loss(sample, real, mode,
                                                     block_rows=br)
    jax.block_until_ready(list(results.values()))

    ok = True
    for (si, mode, real), got in results.items():
        sample, _, tol = cases[si]
        want = _gan_loss_ref(sample, real, mode)
        got_f32 = got.astype(jnp.float32)
        want_f32 = want.astype(jnp.float32)
        if not jnp.allclose(got_f32, want_f32, rtol=tol, atol=tol):
            ok = False
            print(f"MISMATCH case={si} mode={mode} real={real}: "
                  f"got={got_f32} want={want_f32}")

    if ok:
        print("KERNEL_OK")
</pallas_src>

<mosaic_0001>
module attributes {stable_mosaic.version = 11 : i64} {
  func.func @_single_block_kernel(%arg0: i32, %arg1: memref<16x128xf32, #tpu.memory_space<vmem>>, %arg2: memref<1xf32, #tpu.memory_space<smem>>) attributes {dimension_semantics = [#tpu.dimension_semantics<arbitrary>], iteration_bounds = array<i64: 1>, scalar_prefetch = 0 : i64, scratch_operands = 0 : i64, tpu.core_type = #tpu.core_type<tc>, window_params = [{pipeline_mode = #tpu.pipeline_mode<synchronous>, transform_indices = @transform_0, window_bounds = array<i64: 16, 128>}, {transform_indices = @transform_1, window_bounds = array<i64: 1>}]} {
    %c0 = arith.constant 0 : index
    %c0_0 = arith.constant 0 : index
    %0 = vector.load %arg1[%c0, %c0_0] : memref<16x128xf32, #tpu.memory_space<vmem>>, vector<16x128xf32>
    %cst = arith.constant 1.000000e+00 : f32
    %1 = vector.broadcast %cst : f32 to vector<16x128xf32>
    %2 = arith.subf %0, %1 : vector<16x128xf32>
    %3 = arith.mulf %2, %2 : vector<16x128xf32>
    %4 = vector.shape_cast %3 : vector<16x128xf32> to vector<1x16x128xf32>
    %cst_1 = arith.constant dense<0.000000e+00> : vector<1xf32>
    %5 = vector.multi_reduction <add>, %4, %cst_1 [1, 2] : vector<1x16x128xf32> to vector<1xf32>
    %6 = vector.shape_cast %5 : vector<1xf32> to vector<1x1x1xf32>
    %7 = vector.extract %6[0, 0, 0] : f32 from vector<1x1x1xf32>
    %c0_2 = arith.constant 0 : index
    %8 = memref.load %arg2[%c0_2] : memref<1xf32, #tpu.memory_space<smem>>
    memref.store %7, %arg2[%c0_2] : memref<1xf32, #tpu.memory_space<smem>>
    return
  }
  func.func @transform_0(%arg0: i32) -> (i32, i32) {
    %c0_i32 = arith.constant 0 : i32
    %c0_i32_0 = arith.constant 0 : i32
    %c0_i32_1 = arith.constant 0 : i32
    return %c0_i32, %c0_i32_0 : i32, i32
  }
  func.func @transform_1(%arg0: i32) -> i32 {
    %c0_i32 = arith.constant 0 : i32
    %c0_i32_0 = arith.constant 0 : i32
    return %c0_i32 : i32
  }
}

</mosaic_0001>

<bundles_post_ra>
// kernel: tpu_custom_call.1
= control target key start
LH: loop header
LB: loop body
LE: loop exit
PB: predicated region body
PF: predicated region fallthrough
CT: control target
= control target key end

     0   :  { %6 = vsyncpa [#allocation3], 0  ;;  %s137_s0 = inlined_call_operand.hbm [shape: f32[16,128], index: 0, kind: input, shape index: {}]   ;;  %s138_s1 = inlined_call_operand.hbm [shape: f32[1], index: 1, kind: output, shape index: {}]  }
   0x1   :  { %7 = vsyncpa [#allocation4], 0  ;;  %s99_s6 = smov [#allocation2]   ;;  %s63_s10 = scalar_lea.hbm %s137_s0, 256 }
   0x2   :  { %s13_s7 = sshll.u32 %s99_s6, 4  ;;  %p64_p0 = scmp.ne.s32.totalorder %s137_s0, %s63_s10  ;;  %s14_s7 = int_to_ptr.vmem [resolvable:$true] %s13_s7 }
   0x3   :  { %p67_p1 = scmp.lt.u32.totalorder %s63_s10, %s137_s0 }
   0x5   :  { %p69_p2 = pnand %p67_p1, %p64_p0 }
   0x7   :  { %72 = shalt.err (!%p69_p2)
}
   0x8   :  { %s73_s15 = scalar_lea.vmem %s14_s7, 256  ;;  %p78_p4 = scmp.lt.s32.totalorder %s14_s7, %s14_s7 }
   0x9   :  { %p74_p3 = scmp.ne.s32.totalorder %s14_s7, %s73_s15  ;;  %p79_p5 = scmp.lt.s32.totalorder %s73_s15, %s73_s15 }
   0xb   :  { %p80_p6 = por %p79_p5, %p78_p4 }
   0xd   :  { %p81_p7 = pnand %p80_p6, %p74_p3 }
   0xf   :  { %84 = shalt.err (!%p81_p7)
}
  0x10   :  { %s100_s16 = smov 128   ;;  %s101_s17 = smov 8  }
  0x11   :  { %19 = dma.hbm_to_vmem [thread:$0]  %s137_s0, 256, %s14_s7, [#allocation3], %s100_s16, %s100_s16, %s101_s17  }
  0x12   :  { %95 = dma.done.wait [#allocation3], 256  }
  0x13   :  { %96 = vsyncadd [#allocation3], 4294967040  ;;  %v23_v0 = vld [vmem:[#allocation2] sm:$0xff]  ;;  %v24_v1 = vld [vmem:[#allocation2 + $0x8] sm:$0xff]  ;;  %s85_s22 = scalar_lea.hbm %s138_s1, 16 }
  0x14   :  { %v55_v2 = vadd.f32 -1.0, %v23_v0  ;;  %v56_v3 = vadd.f32 -1.0, %v24_v1  ;;  %p86_p8 = scmp.ne.s32.totalorder %s138_s1, %s85_s22  ;;  %p89_p9 = scmp.lt.u32.totalorder %s85_s22, %s138_s1 }
  0x16   :  { %v27_v4 = vmul.f32 %v55_v2, %v55_v2  ;;  %v28_v5 = vmul.f32 %v56_v3, %v56_v3  ;;  %p91_p10 = pnand %p89_p9, %p86_p8 }
  0x18   :  { %v29_v6 = vadd.f32 %v28_v5, %v27_v4 }
  0x1a   :  { %30 = vadd.xlane.f32.xlu0 %v29_v6 }
  0xa7   :  { %v31_v7 = vpop.xlane.xlu0 %30 }
  0xa8   :  { %v32_v8 = vrot.slane %v31_v7, 4 }
  0xaa   :  { %v33_v9 = vadd.f32 %v32_v8, %v31_v7 }
  0xac   :  { %v34_v10 = vrot.slane %v33_v9, 2 }
  0xae   :  { %v35_v11 = vadd.f32 %v34_v10, %v33_v9 }
  0xb0   :  { %v36_v12 = vrot.slane %v35_v11, 1 }
  0xb2   :  { %v37_v13 = vadd.f32 %v36_v12, %v35_v11 }
  0xb4   :  { %57 = vpush %v37_v13 }
  0xe5   :  { %s58_s20 = spop %57 }
  0xe6   :  { %40 = sst [smem:[#allocation5]] %s58_s20 }
  0xe7   :  { %94 = shalt.err (!%p91_p10)
}
  0xe8   :  { %s102_s27 = smov [#allocation5]  }
  0xe9   :  { %48 = dma.smem_to_hbm %s102_s27, 16, %s138_s1, [#allocation4]  }
  0xea   :  { %97 = dma.done.wait [#allocation4], 16  }
  0xeb   :  { %98 = vsyncadd [#allocation4], 4294967280 }
  0xec   :  { %52 = sfence }
  0xed   :  { %53 = vsyncpa [#allocation3], 1 }
  0xee   :  { %54 = vsyncpa [#allocation4], 1 }

</bundles_post_ra>
